<compile_context>
chip_gen: v5e
topology: v5e:2x2
jax: 0.10.0
libtpu: 0.0.40
codegen_flags: <defaults>
</compile_context>

<pallas_src>
import functools

import jax
import jax.numpy as jnp
from jax.experimental import pallas as pl
from jax.experimental.pallas import tpu as pltpu


def _round_down(x, m):
    return (x // m) * m


# ---------------------------------------------------------------------------
# Pass 1: per-(batch, channel) partial sums over the flattened spatial axis.
#   grid = (N, n_c, n_par, n_s_inner); the last axis is the reduction.
#   Accumulates directly into the resident (C_TILE, 1) f32 output block.
# ---------------------------------------------------------------------------
def _pool_sum_kernel(x_ref, sum_ref, *, true_s, s_tile, n_s_inner, needs_mask):
    s = pl.program_id(3)

    @pl.when(s == 0)
    def _():
        sum_ref[...] = jnp.zeros_like(sum_ref)

    xv = x_ref[...].astype(jnp.float32)          # (C_TILE, S_TILE)
    if needs_mask:
        # Global (unclamped) spatial offset of this tile; lanes past the true
        # spatial extent (ragged last tile, or a clamped overhang tile that
        # duplicates data) are zeroed so the sum stays exact.
        tile_global = pl.program_id(2) * n_s_inner + s
        start = tile_global * s_tile
        col = jax.lax.broadcasted_iota(jnp.int32, xv.shape, 1)
        xv = jnp.where(col + start < true_s, xv, 0.0)
    sum_ref[...] += jnp.sum(xv, axis=1, keepdims=True)


# ---------------------------------------------------------------------------
# Pass 2: streaming x * scale (scale already cast to x's dtype, broadcast
# over the spatial axis).  Partial boundary blocks need no mask: garbage
# lanes are computed but never stored.
# ---------------------------------------------------------------------------
def _scale_kernel(x_ref, s_ref, o_ref):
    o_ref[...] = (x_ref[...] * s_ref[...]).astype(o_ref.dtype)


def se3d_forward(x, w1, b1, w2, b2, *, target_block_bytes=1 << 20, s_tile=None):
    """x: (N, C, D, H, W). w1: (SE, C), b1: (SE,), w2: (C, SE), b2: (C,).

    `s_tile` (testing knob): force the spatial tile width; if smaller than the
    flattened spatial size it must be a multiple of 128.
    """
    N, C, D, H, W = x.shape
    S = D * H * W
    dtype = x.dtype
    itemsize = jnp.dtype(dtype).itemsize
    f32 = jnp.float32

    # ---- channel tiling: cdiv-based, full C when modest --------------------
    C_TILE = min(C, 256)                       # full dim if C<=256, else 256
    n_c = pl.cdiv(C, C_TILE)

    # ---- spatial tiling: lane-dense, ~target_block_bytes per block ---------
    if s_tile is not None:
        S_TILE = min(s_tile, S)
    else:
        lane_budget = max(128, target_block_bytes // max(1, C_TILE * itemsize))
        S_TILE = max(128, min(8192, _round_down(lane_budget, 128)))
    if S <= S_TILE:
        S_TILE = S                             # full extent: legal even if %128 != 0
    n_s = pl.cdiv(S, S_TILE)

    # ---- split the pooling reduction into 2 parallel chunks when the rest
    #      of the grid is too small to keep both v7x TensorCores busy --------
    n_par = 2 if (n_s >= 2 and N * n_c < 4) else 1
    n_s_inner = pl.cdiv(n_s, n_par)
    clamp_needed = (n_par * n_s_inner != n_s)  # overhang tile exists
    needs_mask = (S % S_TILE != 0) or clamp_needed

    x_flat = x.reshape(N, C, S)

    if clamp_needed:
        # Clamp so the DMA never targets a block fully past the array end;
        # the kernel's mask (based on the unclamped index) zeroes it out.
        x_map1 = lambda n, c, p, s: (n, c, jnp.minimum(p * n_s_inner + s, n_s - 1))
    else:
        x_map1 = lambda n, c, p, s: (n, c, p * n_s_inner + s)

    pool_kernel = functools.partial(
        _pool_sum_kernel, true_s=S, s_tile=S_TILE,
        n_s_inner=n_s_inner, needs_mask=needs_mask)

    # ------------------------- pass 1: pooled sums --------------------------
    sums = pl.pallas_call(
        pool_kernel,
        out_shape=jax.ShapeDtypeStruct((N, n_par, C, 1), f32),
        grid_spec=pltpu.PrefetchScalarGridSpec(
            num_scalar_prefetch=0,
            grid=(N, n_c, n_par, n_s_inner),
            in_specs=[pl.BlockSpec((None, C_TILE, S_TILE), x_map1)],
            out_specs=pl.BlockSpec((None, None, C_TILE, 1),
                                   lambda n, c, p, s: (n, p, c, 0)),
        ),
        compiler_params=pltpu.CompilerParams(
            dimension_semantics=("parallel", "parallel", "parallel", "arbitrary")),
        cost_estimate=pl.CostEstimate(
            flops=N * C * S, transcendentals=0,
            bytes_accessed=N * C * S * itemsize + N * n_par * C * 4),
    )(x_flat)

    # --------------- excitation: tiny batched matmuls in plain JAX ----------
    pooled = jnp.sum(sums, axis=1)[:, :, 0] / float(S)          # true-S mean (N, C)
    h = pooled @ w1.astype(f32).T + b1.astype(f32)              # (N, SE)
    h = h * jax.nn.sigmoid(h)                                   # swish
    scale = jax.nn.sigmoid(h @ w2.astype(f32).T + b2.astype(f32))   # (N, C)
    scale3 = scale.astype(dtype)[:, :, None]                    # pre-cast, (N, C, 1)

    # --------------------- pass 2: streaming x * scale ----------------------
    out_flat = pl.pallas_call(
        _scale_kernel,
        out_shape=jax.ShapeDtypeStruct((N, C, S), dtype),
        grid_spec=pltpu.PrefetchScalarGridSpec(
            num_scalar_prefetch=0,
            grid=(N, n_c, n_s),
            in_specs=[
                pl.BlockSpec((None, C_TILE, S_TILE), lambda n, c, s: (n, c, s)),
                pl.BlockSpec((None, C_TILE, 1), lambda n, c, s: (n, c, 0)),
            ],
            out_specs=pl.BlockSpec((None, C_TILE, S_TILE), lambda n, c, s: (n, c, s)),
        ),
        compiler_params=pltpu.CompilerParams(
            dimension_semantics=("parallel", "parallel", "parallel")),
        cost_estimate=pl.CostEstimate(
            flops=N * C * S, transcendentals=0,
            bytes_accessed=2 * N * C * S * itemsize + N * C * itemsize),
    )(x_flat, scale3)

    return out_flat.reshape(N, C, D, H, W)


def se3d_reference(x, w1, b1, w2, b2):
    """Pure-JAX reference mirroring the PyTorch forward."""
    pooled = jnp.mean(x.astype(jnp.float32), axis=(2, 3, 4))    # (N, C)
    h = pooled @ w1.T + b1
    h = h * jax.nn.sigmoid(h)
    s = jax.nn.sigmoid(h @ w2.T + b2)
    return x * s[:, :, None, None, None].astype(x.dtype)


if __name__ == "__main__":
    key = jax.random.PRNGKey(0)
    kx, k1, k2, k3, k4, ky, kz = jax.random.split(key, 7)

    # Small shapes consistent with the module: N=2, in_channels=8, se_channels=4.
    N, C, SE = 2, 8, 4
    # Conv3d weights are (out, in, 1, 1, 1); kernel-size-1 conv == matmul,
    # so they are kept squeezed to (out, in).
    w1 = jax.random.normal(k1, (SE, C), dtype=jnp.float32) * 0.1   # se1 weight
    b1 = jax.random.normal(k2, (SE,), dtype=jnp.float32) * 0.1     # se1 bias
    w2 = jax.random.normal(k3, (C, SE), dtype=jnp.float32) * 0.1   # se2 weight
    b2 = jax.random.normal(k4, (C,), dtype=jnp.float32) * 0.1      # se2 bias

    # Check 1: lane-aligned spatial (8^3 = 512), single-tile path.
    x = jax.random.normal(kx, (N, C, 8, 8, 8), dtype=jnp.float32)
    out = se3d_forward(x, w1, b1, w2, b2)
    jax.block_until_ready(out)
    ref = se3d_reference(x, w1, b1, w2, b2)
    assert out.shape == x.shape
    assert jnp.allclose(out, ref, atol=1e-5, rtol=1e-5)

    # Check 2: spatial size not a multiple of 128 (7^3 = 343): full-extent
    # tile, no padding, no crop.
    x2 = jax.random.normal(ky, (N, C, 7, 7, 7), dtype=jnp.float32)
    out2 = se3d_forward(x2, w1, b1, w2, b2)
    jax.block_until_ready(out2)
    ref2 = se3d_reference(x2, w1, b1, w2, b2)
    assert out2.shape == x2.shape
    assert jnp.allclose(out2, ref2, atol=1e-5, rtol=1e-5)

    # Check 3: forced small spatial tile (10^3 = 1000, tile 384) -> ragged
    # last tile + 2-way parallel pooling split with a clamped overhang tile.
    x3 = jax.random.normal(kz, (N, C, 10, 10, 10), dtype=jnp.float32)
    out3 = se3d_forward(x3, w1, b1, w2, b2, s_tile=384)
    jax.block_until_ready(out3)
    ref3 = se3d_reference(x3, w1, b1, w2, b2)
    assert jnp.allclose(out3, ref3, atol=1e-5, rtol=1e-5)

    # Check 4: bf16 streaming path (multiply in input dtype, pre-cast scale).
    xb = x3.astype(jnp.bfloat16)
    outb = se3d_forward(xb, w1, b1, w2, b2, s_tile=256)
    jax.block_until_ready(outb)
    refb = se3d_reference(xb, w1, b1, w2, b2)
    assert jnp.allclose(outb.astype(jnp.float32), refb.astype(jnp.float32),
                        atol=5e-2, rtol=5e-2)

    print("KERNEL_OK")
</pallas_src>

<mosaic_0001>
module attributes {stable_mosaic.version = 11 : i64} {
  func.func @_pool_sum_kernel(%arg0: i32, %arg1: i32, %arg2: i32, %arg3: i32, %arg4: memref<1x8x512xf32, #tpu.memory_space<vmem>>, %arg5: memref<1x1x8x1xf32, #tpu.memory_space<vmem>>) attributes {dimension_semantics = [#tpu.dimension_semantics<parallel>, #tpu.dimension_semantics<parallel>, #tpu.dimension_semantics<parallel>, #tpu.dimension_semantics<arbitrary>], iteration_bounds = array<i64: 2, 1, 1, 1>, scalar_prefetch = 0 : i64, scratch_operands = 0 : i64, tpu.core_type = #tpu.core_type<tc>, window_params = [{transform_indices = @transform_0, window_bounds = array<i64: 1, 8, 512>}, {transform_indices = @transform_1, window_bounds = array<i64: 1, 1, 8, 1>}]} {
    %c0_i32 = arith.constant 0 : i32
    %0 = arith.cmpi eq, %arg3, %c0_i32 : i32
    %1 = arith.extui %0 : i1 to i32
    %c0_i32_0 = arith.constant 0 : i32
    %2 = arith.cmpi ne, %1, %c0_i32_0 : i32
    scf.if %2 {
      %cst_11 = arith.constant 0.000000e+00 : f32
      %13 = vector.broadcast %cst_11 : f32 to vector<8x1xf32>
      %c0_12 = arith.constant 0 : index
      %c0_13 = arith.constant 0 : index
      %c0_14 = arith.constant 0 : index
      %c0_15 = arith.constant 0 : index
      %14 = vector.load %arg5[%c0_12, %c0_13, %c0_14, %c0_15] : memref<1x1x8x1xf32, #tpu.memory_space<vmem>>, vector<1x1x8x1xf32>
      %15 = vector.shape_cast %14 : vector<1x1x8x1xf32> to vector<8x1xf32>
      %16 = vector.shape_cast %13 : vector<8x1xf32> to vector<1x1x8x1xf32>
      tpu.vector_store %arg5[%c0_12, %c0_13, %c0_14, %c0_15], %16 {strides = array<i32>} : memref<1x1x8x1xf32, #tpu.memory_space<vmem>>, vector<1x1x8x1xf32>,
    } else {
    }
    %c0 = arith.constant 0 : index
    %c0_1 = arith.constant 0 : index
    %c0_2 = arith.constant 0 : index
    %3 = vector.load %arg4[%c0, %c0_1, %c0_2] : memref<1x8x512xf32, #tpu.memory_space<vmem>>, vector<1x8x512xf32>
    %4 = vector.shape_cast %3 : vector<1x8x512xf32> to vector<8x512xf32>
    %c0_3 = arith.constant 0 : index
    %c0_4 = arith.constant 0 : index
    %c0_5 = arith.constant 0 : index
    %c0_6 = arith.constant 0 : index
    %5 = vector.load %arg5[%c0_3, %c0_4, %c0_5, %c0_6] : memref<1x1x8x1xf32, #tpu.memory_space<vmem>>, vector<1x1x8x1xf32>
    %6 = vector.shape_cast %5 : vector<1x1x8x1xf32> to vector<8x1xf32>
    %cst = arith.constant dense<0.000000e+00> : vector<8xf32>
    %7 = vector.multi_reduction <add>, %4, %cst [1] : vector<8x512xf32> to vector<8xf32>
    %8 = vector.shape_cast %7 : vector<8xf32> to vector<8x1xf32>
    %9 = arith.addf %6, %8 : vector<8x1xf32>
    %c0_7 = arith.constant 0 : index
    %c0_8 = arith.constant 0 : index
    %c0_9 = arith.constant 0 : index
    %c0_10 = arith.constant 0 : index
    %10 = vector.load %arg5[%c0_7, %c0_8, %c0_9, %c0_10] : memref<1x1x8x1xf32, #tpu.memory_space<vmem>>, vector<1x1x8x1xf32>
    %11 = vector.shape_cast %10 : vector<1x1x8x1xf32> to vector<8x1xf32>
    %12 = vector.shape_cast %9 : vector<8x1xf32> to vector<1x1x8x1xf32>
    tpu.vector_store %arg5[%c0_7, %c0_8, %c0_9, %c0_10], %12 {strides = array<i32>} : memref<1x1x8x1xf32, #tpu.memory_space<vmem>>, vector<1x1x8x1xf32>,
    return
  }
  func.func @transform_0(%arg0: i32, %arg1: i32, %arg2: i32, %arg3: i32) -> (i32, i32, i32) {
    %c1_i32 = arith.constant 1 : i32
    %0 = arith.muli %arg2, %c1_i32 : i32
    %1 = arith.addi %0, %arg3 : i32
    %c0_i32 = arith.constant 0 : i32
    return %arg0, %arg1, %1 : i32, i32, i32
  }
  func.func @transform_1(%arg0: i32, %arg1: i32, %arg2: i32, %arg3: i32) -> (i32, i32, i32, i32) {
    %c0_i32 = arith.constant 0 : i32
    %c0_i32_0 = arith.constant 0 : i32
    return %arg0, %arg2, %arg1, %c0_i32 : i32, i32, i32, i32
  }
}

</mosaic_0001>

<bundles_post_ra>
// kernel: tpu_custom_call.1
= control target key start
LH: loop header
LB: loop body
LE: loop exit
PB: predicated region body
PF: predicated region fallthrough
CT: control target
= control target key end

     0   :  { %6 = vsyncpa [#allocation3], 0  ;;  %s566_s0 = inlined_call_operand.hbm [shape: f32[2,8,512], index: 0, kind: input, shape index: {}]   ;;  %s567_s1 = inlined_call_operand.vmem [shape: f32[2,1,8,1], index: 1, kind: output, shape index: {}]  }
   0x1   :  { %8 = vsyncpa [#allocation3 + $0x1], 0  ;;  %s476_s6 = smov 0   ;;  %s478_s7 = smov 0  }
   0x2   :  { %s480_s8 = smov 0   ;;  %s482_s9 = smov 0  }
   0x3   :  { %s484_s10 = smov 0   ;;  %s486_s11 = smov 0  }
   0x4 LB: > { %s314_s12 = sadd.s32 4294967295, %s463_s11   ;;  %s40_s13 = sadd.s32 1, %s459_s10  ;;  %s463_s11 = sphi %s486_s11, %s14_s11   ;;  %s459_s10 = sphi %s484_s10, %s574_s10   ;;  %s455_s9 = sphi %s482_s9, %s573_s9   ;;  %s451_s8 = sphi %s480_s8, %s572_s8   ;;  %s447_s7 = sphi %s478_s7, %s571_s7   ;;  %s443_s6 = sphi %s476_s6, %s570_s6  }
   0x5   : > { %p42_p0 = scmp.ge.s32.totalorder %s40_s13, 2  ;;  %s53_s14 = sadd.s32 1, %s451_s8 }
   0x6   : > { %p60_p1 = scmp.ne.s32.totalorder %s451_s8, %s447_s7  ;;  %p61_p2 = scmp.eq.s32.totalorder %s463_s11, 0 }
   0x7   : > { %s576_s13 = smov (%p42_p0, %s40_s13), 0  ;;  %p66_p4 = scmp.ne.s32.totalorder %s447_s7, %s443_s6 }
   0x8   : > { %p512_p3 = por %p61_p2, %p60_p1  ;;  %s46_s16 = ssub.s32 %s459_s10, %s576_s13 }
   0x9   : > { %p67_p5 = scmp.eq.s32.totalorder %s314_s12, 0  ;;  %p51_p6 = scmp.eq.s32.totalorder %s46_s16, 0 }
   0xa   : > { %p333_p8 = scmp.lt.s32.totalorder %s463_s11, 2  ;;  %s120_s19 = sand.u32 1, %s451_s8  }
   0xb   : > { %p519_p7 = por %p67_p5, %p66_p4  ;;  %s326_s20 = sshll.u32 %s459_s10, 5 }
   0xc   : > { %s525_s18 = scalar_select %p51_p6, %s451_s8, %s53_s14  }
   0xd   : > { %s318_s21 = sshll.u32 %s120_s19, 5  ;;  %s134_s24 = scalar_lea.hbm %s566_s0, %s326_s20 }
   0xe   : > { %s136_s25 = sshll.u32 %s134_s24, 4  ;;  %s124_s26 = scalar_lea.vmem [#allocation2], %s318_s21  ;;  %s137_s25 = int_to_ptr.hbm [resolvable:$true] %s136_s25 }
   0xf   : > { %s138_s27 = sshll.u32 %s124_s26, 4  ;;  %p330_p9 = pnand %p333_p8, %p512_p3  ;;  %s139_s27 = int_to_ptr.vmem [resolvable:$true] %s138_s27 }
  0x10   : > { %p321_p10 = scmp.ge.s32.totalorder %s463_s11, 1  ;;  %p143_p11 = scmp.lt.s32.totalorder %s463_s11, 3 }
  0x11   : > { %s121_s28 = scalar_lea.sflag [#allocation3], %s120_s19 }
  0x12   : > { %332 = dma.hbm_to_vmem [thread:$0]  (!%p330_p9), %s137_s25, 512, %s139_s27, %s121_s28  }
  0x13   : > { %p144_p12 = pnand %p321_p10, %p143_p11 }
  0x14   : > { %s149_s29 = sand.u32 (!%p144_p12), 1, %s447_s7  }
  0x15   : > { %147 = sbr.rel (%p144_p12) target bundleno = 153 (0x99), region = 24  ;;  %s322_s30 = sshll.u32 (!%p144_p12), %s149_s29, 5 }
  0x16   : > { %s150_s2 = scalar_lea.sflag (!%p144_p12), [#allocation3], %s149_s29  ;;  %s153_s3 = scalar_lea.vmem (!%p144_p12), [#allocation2], %s322_s30 }
  0x1a   : > { %438 = dma.done.wait (%p519_p7), %s150_s2, 512  }
  0x1b   : > { %440 = vsyncadd (%p519_p7), %s150_s2, 4294966784  ;;  %p180_p13 = scmp.lt.s32.totalorder %s455_s9, 1  ;;  %vm194_vm0 = vcmask 7168   ;;  %v465_v0 = vmov 0.0   ;;  %v196_v1 = vld [vmem:[%s153_s3] sm:$0xff]  ;;  %v197_v2 = vld [vmem:[%s153_s3 + $0x8] sm:$0xff] }
  0x1c   : > { %v198_v3 = vld [vmem:[%s153_s3 + $0x10] sm:$0xff]  ;;  %v201_v4 = vadd.f32 %v197_v2, %v196_v1  ;;  %v199_v5 = vld [vmem:[%s153_s3 + $0x18] sm:$0xff] }
  0x1d   : > { %s578_s9 = smov (!%p180_p13, %s455_s9), 1 }
  0x1e   : > { %s323_s4 = sshll.u32 %s578_s9, 3  ;;  %v202_v6 = vadd.f32 %v201_v4, %v198_v3 }
  0x1f   : > { %s189_s12 = scalar_lea.vmem %s567_s1, %s323_s4 }
  0x20   : > { %195 = vst.msk [vmem:[%s189_s12] sm:$0xff] %vm194_vm0, %v465_v0  ;;  %v203_v7 = vadd.f32 %v202_v6, %v199_v5 }
  0x22   : > { %204 = vadd.xlane.f32.xlu0 %v203_v7 }
  0x27   : > { %v200_v8 = vld [vmem:[%s189_s12] sm:$0xff] }
  0x95   : > { %v205_v9 = vpop.xlane.xlu0 %204 }
  0x96   : > { %v206_v10 = vadd.f32 %v205_v9, %v200_v8 }
  0x98   : > { %208 = vst.msk [vmem:[%s189_s12] sm:$0xff] %vm194_vm0, %v206_v10 }
  0x99 PF: > { %s14_s11 = sadd.s32 1, %s463_s11   ;;  %s570_s6 = smov %s447_s7 }
  0x9a   : > { %p11_p0 = scmp.ge.s32.totalorder %s14_s11, 4   ;;  %s571_s7 = smov %s451_s8 }
  0x9b   : > { %s572_s8 = smov %s525_s18  ;;  %s573_s9 = smov %s459_s10 }
  0x9c   : > { %s574_s10 = smov %s576_s13  ;;  %13 = sbr.rel (!%p11_p0) target bundleno = 4 (0x4), region = 68 }
  0xa1   :  { %240 = vsyncpa [#allocation3], 1 }
  0xa2   :  { %242 = vsyncpa [#allocation3 + $0x1], 1 }

</bundles_post_ra>
